<compile_context>
chip_gen: v7x
topology: tpu7x:2x2x1
jax: 0.10.0
libtpu: 0.0.40
codegen_flags: <defaults>
</compile_context>

<pallas_src>
import jax
import jax.numpy as jnp
from jax.experimental import pallas as pl
from jax.experimental.pallas import tpu as pltpu


def linear_kernel(x_ref, w_ref, b_ref, o_ref):
    # x_ref: (B, IN)    activations
    # w_ref: (IN, OUT)  weight, pre-transposed once at init
    # b_ref: (1, OUT)   bias
    # o_ref: (B, OUT)
    y = jnp.dot(x_ref[...], w_ref[...], preferred_element_type=jnp.float32)
    o_ref[...] = (y + b_ref[...]).astype(o_ref.dtype)


def prepare_params(weight, bias):
    """One-time parameter prep (outside the per-call path).

    weight: (OUT, IN) in PyTorch convention -> returns (IN, OUT) plus (1, OUT)
    bias so the kernel does a plain contraction with no in-kernel transpose.
    """
    w_t = jnp.asarray(weight).T          # (IN, OUT), paid once at init
    b2 = jnp.asarray(bias).reshape(1, -1)  # (1, OUT)
    return w_t, b2


def linear_pallas(x, w_t, b2):
    """x: (B, IN) f32; w_t: (IN, OUT) f32 (pre-transposed); b2: (1, OUT) f32."""
    B, IN = x.shape
    OUT = w_t.shape[1]

    cost = pl.CostEstimate(
        flops=2 * B * IN * OUT,
        transcendentals=0,
        bytes_accessed=(B * IN + IN * OUT + OUT + B * OUT) * 4,
    )

    return pl.pallas_call(
        linear_kernel,
        out_shape=jax.ShapeDtypeStruct((B, OUT), x.dtype),
        in_specs=[
            pl.BlockSpec(memory_space=pltpu.MemorySpace.VMEM),
            pl.BlockSpec(memory_space=pltpu.MemorySpace.VMEM),
            pl.BlockSpec(memory_space=pltpu.MemorySpace.VMEM),
        ],
        out_specs=pl.BlockSpec(memory_space=pltpu.MemorySpace.VMEM),
        cost_estimate=cost,
    )(x, w_t, b2)


if __name__ == "__main__":
    key = jax.random.PRNGKey(0)
    kx, kw, kb = jax.random.split(key, 3)

    B, IN, OUT = 8, 10, 10
    x = jax.random.normal(kx, (B, IN), dtype=jnp.float32)

    # Deterministic parameter init (mimics nn.Linear's uniform(-1/sqrt(in), 1/sqrt(in)))
    bound = 1.0 / (IN ** 0.5)
    weight = jax.random.uniform(kw, (OUT, IN), minval=-bound, maxval=bound,
                                dtype=jnp.float32)
    bias = jax.random.uniform(kb, (OUT,), minval=-bound, maxval=bound,
                              dtype=jnp.float32)

    # One-time layout prep (not in the per-call path).
    w_t, b2 = prepare_params(weight, bias)
    w_t = jax.block_until_ready(w_t)
    b2 = jax.block_until_ready(b2)

    linear = jax.jit(linear_pallas)
    y = linear(x, w_t, b2)
    y = jax.block_until_ready(y)

    # Reference check against plain JAX
    y_ref = x @ weight.T + bias
    assert y.shape == (B, OUT), f"bad shape {y.shape}"
    assert jnp.allclose(y, y_ref, atol=1e-5, rtol=1e-5), "mismatch vs reference"

    print("KERNEL_OK")
</pallas_src>

<mosaic_0001>
module attributes {stable_mosaic.version = 11 : i64} {
  func.func @linear_kernel(%arg0: memref<8x10xf32, #tpu.memory_space<vmem>>, %arg1: memref<10x10xf32, #tpu.memory_space<vmem>>, %arg2: memref<1x10xf32, #tpu.memory_space<vmem>>, %arg3: memref<8x10xf32, #tpu.memory_space<vmem>>) attributes {dimension_semantics = [], scalar_prefetch = 0 : i64, scratch_operands = 0 : i64, tpu.core_type = #tpu.core_type<tc>} {
    %c0 = arith.constant 0 : index
    %c0_0 = arith.constant 0 : index
    %0 = vector.load %arg0[%c0, %c0_0] : memref<8x10xf32, #tpu.memory_space<vmem>>, vector<8x10xf32>
    %c0_1 = arith.constant 0 : index
    %c0_2 = arith.constant 0 : index
    %1 = vector.load %arg1[%c0_1, %c0_2] : memref<10x10xf32, #tpu.memory_space<vmem>>, vector<10x10xf32>
    %cst = arith.constant dense<0.000000e+00> : vector<8x10xf32>
    %2 = tpu.matmul %0, %1, %cst {dimension_numbers = #tpu.dot_dimension_numbers<[1], [0], [0], [1], [0, 0, 1, 1], [], []>} : vector<8x10xf32>, vector<10x10xf32>, vector<8x10xf32> -> vector<8x10xf32>
    %c0_3 = arith.constant 0 : index
    %c0_4 = arith.constant 0 : index
    %3 = vector.load %arg2[%c0_3, %c0_4] : memref<1x10xf32, #tpu.memory_space<vmem>>, vector<1x10xf32>
    %4 = vector.broadcast %3 : vector<1x10xf32> to vector<8x10xf32>
    %5 = arith.addf %2, %4 : vector<8x10xf32>
    %c0_5 = arith.constant 0 : index
    %c0_6 = arith.constant 0 : index
    %6 = vector.load %arg3[%c0_5, %c0_6] : memref<8x10xf32, #tpu.memory_space<vmem>>, vector<8x10xf32>
    tpu.vector_store %arg3[%c0_5, %c0_6], %5 {strides = array<i32>} : memref<8x10xf32, #tpu.memory_space<vmem>>, vector<8x10xf32>,
    return
  }
}

</mosaic_0001>

<bundles_post_ra>
// kernel: linear_pallas.1
= control target key start
LH: loop header
LB: loop body
LE: loop exit
PB: predicated region body
PF: predicated region fallthrough
CT: control target
= control target key end

     0   :  { %8 = vsyncpa [#allocation3], 0  ;;  %s319_s0 = inlined_call_operand.hbm [shape: f32[8,10], index: 0, kind: input, shape index: {}]   ;;  %s320_s1 = inlined_call_operand.hbm [shape: f32[10,10], index: 1, kind: input, shape index: {}]   ;;  %s321_s2 = inlined_call_operand.vmem [shape: f32[1,10], index: 2, kind: input, shape index: {}]   ;;  %s322_s3 = inlined_call_operand.hbm [shape: f32[8,10], index: 3, kind: output, shape index: {}]  }
   0x1   :  { %9 = vsyncpa [#allocation6], 0 }
   0x2   :  { %10 = vsyncpa [#allocation4], 0  ;;  %s244_s12 = smov [#allocation2]   ;;  %s245_s14 = smov [#allocation5]  }
   0x3   :  { %s17_s13 = sshll.u32 %s244_s12, 4  ;;  %s26_s15 = sshll.u32 %s245_s14, 4  ;;  %s18_s13 = int_to_ptr.vmem [resolvable:$true] %s17_s13  ;;  %s273_s15 = int_to_ptr.vmem [resolvable:$true] %s26_s15 }
   0x4   :  { %s172_s18 = scalar_lea.hbm %s319_s0, 128 }
   0x5   :  { %p173_p0 = scmp.ne.s32.totalorder %s319_s0, %s172_s18  ;;  %p176_p1 = scmp.lt.u32.totalorder %s172_s18, %s319_s0 }
   0x7   :  { %p178_p2 = pnand %p176_p1, %p173_p0 }
   0x9   :  { %181 = shalt.err (!%p178_p2)
}
   0xa   :  { %s182_s23 = scalar_lea.vmem %s18_s13, 128  ;;  %p187_p4 = scmp.lt.s32.totalorder %s18_s13, %s18_s13 }
   0xb   :  { %p183_p3 = scmp.ne.s32.totalorder %s18_s13, %s182_s23  ;;  %p188_p5 = scmp.lt.s32.totalorder %s182_s23, %s182_s23 }
   0xd   :  { %p189_p6 = por %p188_p5, %p187_p4 }
   0xf   :  { %p190_p7 = pnand %p189_p6, %p183_p3 }
  0x11   :  { %193 = shalt.err (!%p190_p7)
}
  0x12   :  { %20 = dma.hbm_to_vmem [thread:$0]  %s319_s0, 128, %s18_s13, [#allocation3]  }
  0x13   :  { %s194_s28 = scalar_lea.hbm %s320_s1, 256 }
  0x14   :  { %p195_p8 = scmp.ne.s32.totalorder %s320_s1, %s194_s28  ;;  %p198_p9 = scmp.lt.u32.totalorder %s194_s28, %s320_s1 }
  0x16   :  { %p200_p10 = pnand %p198_p9, %p195_p8 }
  0x18   :  { %203 = shalt.err (!%p200_p10)
}
  0x19   :  { %s204_s6 = scalar_lea.vmem %s273_s15, 256  ;;  %p209_p12 = scmp.lt.s32.totalorder %s273_s15, %s273_s15 }
  0x1a   :  { %p205_p11 = scmp.ne.s32.totalorder %s273_s15, %s204_s6  ;;  %p210_p13 = scmp.lt.s32.totalorder %s204_s6, %s204_s6 }
  0x1c   :  { %p211_p0 = por %p210_p13, %p209_p12 }
  0x1e   :  { %p212_p1 = pnand %p211_p0, %p205_p11 }
  0x20   :  { %215 = shalt.err (!%p212_p1)
}
  0x21   :  { %s246_s0 = smov 128   ;;  %s247_s7 = smov 8  }
  0x22   :  { %32 = dma.hbm_to_vmem [thread:$0]  %s320_s1, 256, %s273_s15, [#allocation6], %s246_s0, %s246_s0, %s247_s7  }
  0x23   :  { %238 = dma.done.wait [#allocation3], 128  }
  0x24   :  { %239 = vsyncadd [#allocation3], 4294967168 }
  0x25   :  { %240 = dma.done.wait [#allocation6], 256  }
  0x26   :  { %241 = vsyncadd [#allocation6], 4294967040  ;;  %v248_v0 = vmov 0.0|0.0   ;;  %vm249_vm0 = vmmov 0   ;;  %v250_v1 = vmov 0.0   ;;  %vm55_vm1 = vcmask 1041408  }
  0x27   :  { %159 = vmatprep.subr.bf16.mxu0 %v248_v0  ;;  %156 = vmatprep.mubr.msk.f32.mxu0 %vm249_vm0, %v250_v1  ;;  %v42_v2 = vld [vmem:[#allocation5] sm:$0xff]  ;;  %v43_v3 = vld [vmem:[#allocation5 + $0x8] sm:$0x3]  ;;  %vm251_vm2 = vmmov 1   ;;  %v41_v5 = vld [vmem:[#allocation2] sm:$0xff]  ;;  %vm51_vm4 = vcmask 80896  }
  0x28   :  { %vm161_vm3 = vmpackc.low %vm55_vm1, %vm251_vm2  ;;  %v160_v4 = vpack.c.bf16 %v43_v3, %v42_v2  ;;  %v146_v6 = vld [vmem:[%s321_s2] ss:$0 sm:$0xff]  ;;  %s252_s11 = smov [#allocation7]  }
  0x29   :  { %s136_s12 = sshll.u32 %s252_s11, 4  ;;  %s137_s12 = int_to_ptr.vmem [resolvable:$true] %s136_s12 }
  0x2a   :  { %162 = vmatpush3.bf16.msk.msra.mxu0 %vm161_vm3, %v160_v4  ;;  %s216_s13 = scalar_lea.vmem %s137_s12, 128  ;;  %p221_p3 = scmp.lt.s32.totalorder %s137_s12, %s137_s12 }
  0x2b   :  { %p217_p2 = scmp.ne.s32.totalorder %s137_s12, %s216_s13  ;;  %p222_p4 = scmp.lt.s32.totalorder %s216_s13, %s216_s13 }
  0x2d   :  { %157 = vmatmul.mubr.msk.f32.vlgmr.msra.gmra.mrb[0].mxu0 %vm51_vm4, %v41_v5  ;;  %p223_p5 = por %p222_p4, %p221_p3 }
  0x2f   :  { %p224_p6 = pnand %p223_p5, %p217_p2 }
 0x100   :  { %v125_v7 = vpop.f32.mrb[0].mxu0 }
 0x101   :  { %v126_v8 = vadd.f32 %v146_v6, %v125_v7  ;;  %v158_v9 = vpop.f32.mrb[1].mxu0 }
 0x103   :  { %129 = vst.msk [vmem:[#allocation7] sm:$0xff] %vm51_vm4, %v126_v8 }
 0x104   :  { %227 = shalt.err (!%p224_p6)
}
 0x105   :  { %s228_s16 = scalar_lea.hbm %s322_s3, 128 }
 0x106   :  { %p229_p7 = scmp.ne.s32.totalorder %s322_s3, %s228_s16  ;;  %p232_p8 = scmp.lt.u32.totalorder %s228_s16, %s322_s3 }
 0x108   :  { %p234_p9 = pnand %p232_p8, %p229_p7 }
 0x10a   :  { %237 = shalt.err (!%p234_p9)
}
 0x10b   :  { %139 = dma.vmem_to_hbm [thread:$0]  %s137_s12, 128, %s322_s3, [#allocation4]  }
 0x10c   :  { %242 = dma.done.wait [#allocation4], 128  }
 0x10d   :  { %243 = vsyncadd [#allocation4], 4294967168 }
 0x10e   :  { %143 = vsyncpa [#allocation3], 1 }
 0x10f   :  { %144 = vsyncpa [#allocation6], 1 }
 0x110   :  { %145 = vsyncpa [#allocation4], 1 }

</bundles_post_ra>
